<compile_context>
chip_gen: v7x
topology: tpu7x:2x2x1
jax: 0.10.0
libtpu: 0.0.40
codegen_flags: <defaults>
</compile_context>

<pallas_src>
import jax
import jax.numpy as jnp
from jax.experimental import pallas as pl
from jax.experimental.pallas import tpu as pltpu

LANES = 128      # vreg lane width
SUBLANES = 8     # f32 vreg sublane count
HIDDEN = 16      # fc1 out_features == fc4 in_features


def mlp_kernel(params_ref, x_ref, o_ref):
    # params_ref: SMEM f32[3*HIDDEN + 1] laid out as [w1 | b1 | w4 | b4].
    # x_ref / o_ref: lane-dense f32 (row_tile, 128) tiles; batch elements are
    # spread over (sublane, lane), so everything is per-element VPU math.
    x = x_ref[...]
    acc = jnp.zeros_like(x)
    # Unrolled 16-step mul/add/ReLU chain — no MXU pass, no cross-lane reduce.
    for j in range(HIDDEN):
        w1j = params_ref[j]
        b1j = params_ref[HIDDEN + j]
        w4j = params_ref[2 * HIDDEN + j]
        acc = acc + w4j * jnp.maximum(x * w1j + b1j, 0.0)
    o_ref[...] = (acc + params_ref[3 * HIDDEN]).astype(o_ref.dtype)


def mlp_forward(x, w1, b1, w4, b4, *, max_row_tile=1024):
    """y = relu(x @ w1.T + b1) @ w4.T + b4  (PyTorch nn.Linear layout).

    x: (B, 1) f32; w1: (16, 1); b1: (16,); w4: (1, 16); b4: (1,).
    """
    B = x.shape[0]

    # Pack all parameters into one scalar table (lives in SMEM).
    params = jnp.concatenate([
        w1.reshape(HIDDEN).astype(jnp.float32),
        b1.reshape(HIDDEN).astype(jnp.float32),
        w4.reshape(HIDDEN).astype(jnp.float32),
        b4.reshape(1).astype(jnp.float32),
    ])

    # Re-layout batch onto (sublane, lane): pad B up to rows*128 where rows is
    # a multiple of the row tile (which is itself a multiple of 8 sublanes).
    rows = max(pl.cdiv(B, LANES), 1)
    rows = ((rows + SUBLANES - 1) // SUBLANES) * SUBLANES
    row_tile = max(SUBLANES, min(max_row_tile, rows))
    row_tile = (row_tile // SUBLANES) * SUBLANES
    rows = ((rows + row_tile - 1) // row_tile) * row_tile
    padded = rows * LANES

    xf = x.reshape(B).astype(jnp.float32)
    if padded != B:
        xf = jnp.pad(xf, (0, padded - B))
    x2 = xf.reshape(rows, LANES)

    out2 = pl.pallas_call(
        mlp_kernel,
        out_shape=jax.ShapeDtypeStruct((rows, LANES), jnp.float32),
        grid=(rows // row_tile,),
        in_specs=[
            # Parameter table: untiled, SMEM-resident, copied once.
            pl.BlockSpec(memory_space=pltpu.MemorySpace.SMEM),
            # Lane-dense batch tiles, auto double-buffered.
            pl.BlockSpec((row_tile, LANES), lambda i: (i, 0)),
        ],
        out_specs=pl.BlockSpec((row_tile, LANES), lambda i: (i, 0)),
        compiler_params=pltpu.CompilerParams(
            dimension_semantics=("parallel",),  # shard batch tiles across TCs (v7x)
        ),
    )(params, x2)

    # Drop the padding and restore the (B, 1) PyTorch shape.
    return out2.reshape(padded)[:B].reshape(B, 1)


def torch_linear_init(key, out_features, in_features):
    """Deterministic init mimicking PyTorch nn.Linear default (U[-1/sqrt(fan_in), +])."""
    bound = 1.0 / jnp.sqrt(jnp.float32(in_features))
    kw, kb = jax.random.split(key)
    w = jax.random.uniform(kw, (out_features, in_features), jnp.float32, -bound, bound)
    b = jax.random.uniform(kb, (out_features,), jnp.float32, -bound, bound)
    return w, b


def reference(x, w1, b1, w4, b4):
    return jnp.maximum(x @ w1.T + b1, 0.0) @ w4.T + b4


if __name__ == "__main__":
    key = jax.random.PRNGKey(0)
    kx, k1, k4, kx2 = jax.random.split(key, 4)

    w1, b1 = torch_linear_init(k1, 16, 1)   # fc1: Linear(1, 16)
    w4, b4 = torch_linear_init(k4, 1, 16)   # fc4: Linear(16, 1)

    # Small case consistent with the module's forward: x is (B, 1).
    B = 8
    x = jax.random.normal(kx, (B, 1), jnp.float32)
    out = jax.block_until_ready(mlp_forward(x, w1, b1, w4, b4))
    ref = reference(x, w1, b1, w4, b4)
    assert out.shape == (B, 1)
    assert jnp.allclose(out, ref, atol=1e-5, rtol=1e-5)

    # Second case exercising padding + a multi-tile lane-dense grid.
    B2 = 3000
    x2 = jax.random.normal(kx2, (B2, 1), jnp.float32)
    out2 = jax.block_until_ready(mlp_forward(x2, w1, b1, w4, b4, max_row_tile=8))
    ref2 = reference(x2, w1, b1, w4, b4)
    assert out2.shape == (B2, 1)
    assert jnp.allclose(out2, ref2, atol=1e-5, rtol=1e-5)

    print("KERNEL_OK")
</pallas_src>

<mosaic_0001>
module attributes {stable_mosaic.version = 11 : i64} {
  func.func @mlp_kernel(%arg0: i32, %arg1: memref<49xf32, #tpu.memory_space<smem>>, %arg2: memref<8x128xf32, #tpu.memory_space<vmem>>, %arg3: memref<8x128xf32, #tpu.memory_space<vmem>>) attributes {dimension_semantics = [#tpu.dimension_semantics<parallel>], iteration_bounds = array<i64: 1>, scalar_prefetch = 0 : i64, scratch_operands = 0 : i64, tpu.core_type = #tpu.core_type<tc>, window_params = [{transform_indices = @transform_0, window_bounds = array<i64: 49>}, {transform_indices = @transform_1, window_bounds = array<i64: 8, 128>}, {transform_indices = @transform_2, window_bounds = array<i64: 8, 128>}]} {
    %c0 = arith.constant 0 : index
    %c0_0 = arith.constant 0 : index
    %0 = vector.load %arg2[%c0, %c0_0] : memref<8x128xf32, #tpu.memory_space<vmem>>, vector<8x128xf32>
    %cst = arith.constant 0.000000e+00 : f32
    %1 = vector.broadcast %cst : f32 to vector<8x128xf32>
    %c0_1 = arith.constant 0 : index
    %2 = memref.load %arg1[%c0_1] : memref<49xf32, #tpu.memory_space<smem>>
    %c16 = arith.constant 16 : index
    %3 = memref.load %arg1[%c16] : memref<49xf32, #tpu.memory_space<smem>>
    %c32 = arith.constant 32 : index
    %4 = memref.load %arg1[%c32] : memref<49xf32, #tpu.memory_space<smem>>
    %5 = vector.broadcast %2 : f32 to vector<8x128xf32>
    %6 = arith.mulf %0, %5 : vector<8x128xf32>
    %7 = vector.broadcast %3 : f32 to vector<8x128xf32>
    %8 = arith.addf %6, %7 : vector<8x128xf32>
    %cst_2 = arith.constant 0.000000e+00 : f32
    %9 = vector.broadcast %cst_2 : f32 to vector<8x128xf32>
    %10 = arith.maximumf %8, %9 : vector<8x128xf32>
    %11 = vector.broadcast %4 : f32 to vector<8x128xf32>
    %12 = arith.mulf %11, %10 : vector<8x128xf32>
    %13 = arith.addf %1, %12 : vector<8x128xf32>
    %c1 = arith.constant 1 : index
    %14 = memref.load %arg1[%c1] : memref<49xf32, #tpu.memory_space<smem>>
    %c17 = arith.constant 17 : index
    %15 = memref.load %arg1[%c17] : memref<49xf32, #tpu.memory_space<smem>>
    %c33 = arith.constant 33 : index
    %16 = memref.load %arg1[%c33] : memref<49xf32, #tpu.memory_space<smem>>
    %17 = vector.broadcast %14 : f32 to vector<8x128xf32>
    %18 = arith.mulf %0, %17 : vector<8x128xf32>
    %19 = vector.broadcast %15 : f32 to vector<8x128xf32>
    %20 = arith.addf %18, %19 : vector<8x128xf32>
    %cst_3 = arith.constant 0.000000e+00 : f32
    %21 = vector.broadcast %cst_3 : f32 to vector<8x128xf32>
    %22 = arith.maximumf %20, %21 : vector<8x128xf32>
    %23 = vector.broadcast %16 : f32 to vector<8x128xf32>
    %24 = arith.mulf %23, %22 : vector<8x128xf32>
    %25 = arith.addf %13, %24 : vector<8x128xf32>
    %c2 = arith.constant 2 : index
    %26 = memref.load %arg1[%c2] : memref<49xf32, #tpu.memory_space<smem>>
    %c18 = arith.constant 18 : index
    %27 = memref.load %arg1[%c18] : memref<49xf32, #tpu.memory_space<smem>>
    %c34 = arith.constant 34 : index
    %28 = memref.load %arg1[%c34] : memref<49xf32, #tpu.memory_space<smem>>
    %29 = vector.broadcast %26 : f32 to vector<8x128xf32>
    %30 = arith.mulf %0, %29 : vector<8x128xf32>
    %31 = vector.broadcast %27 : f32 to vector<8x128xf32>
    %32 = arith.addf %30, %31 : vector<8x128xf32>
    %cst_4 = arith.constant 0.000000e+00 : f32
    %33 = vector.broadcast %cst_4 : f32 to vector<8x128xf32>
    %34 = arith.maximumf %32, %33 : vector<8x128xf32>
    %35 = vector.broadcast %28 : f32 to vector<8x128xf32>
    %36 = arith.mulf %35, %34 : vector<8x128xf32>
    %37 = arith.addf %25, %36 : vector<8x128xf32>
    %c3 = arith.constant 3 : index
    %38 = memref.load %arg1[%c3] : memref<49xf32, #tpu.memory_space<smem>>
    %c19 = arith.constant 19 : index
    %39 = memref.load %arg1[%c19] : memref<49xf32, #tpu.memory_space<smem>>
    %c35 = arith.constant 35 : index
    %40 = memref.load %arg1[%c35] : memref<49xf32, #tpu.memory_space<smem>>
    %41 = vector.broadcast %38 : f32 to vector<8x128xf32>
    %42 = arith.mulf %0, %41 : vector<8x128xf32>
    %43 = vector.broadcast %39 : f32 to vector<8x128xf32>
    %44 = arith.addf %42, %43 : vector<8x128xf32>
    %cst_5 = arith.constant 0.000000e+00 : f32
    %45 = vector.broadcast %cst_5 : f32 to vector<8x128xf32>
    %46 = arith.maximumf %44, %45 : vector<8x128xf32>
    %47 = vector.broadcast %40 : f32 to vector<8x128xf32>
    %48 = arith.mulf %47, %46 : vector<8x128xf32>
    %49 = arith.addf %37, %48 : vector<8x128xf32>
    %c4 = arith.constant 4 : index
    %50 = memref.load %arg1[%c4] : memref<49xf32, #tpu.memory_space<smem>>
    %c20 = arith.constant 20 : index
    %51 = memref.load %arg1[%c20] : memref<49xf32, #tpu.memory_space<smem>>
    %c36 = arith.constant 36 : index
    %52 = memref.load %arg1[%c36] : memref<49xf32, #tpu.memory_space<smem>>
    %53 = vector.broadcast %50 : f32 to vector<8x128xf32>
    %54 = arith.mulf %0, %53 : vector<8x128xf32>
    %55 = vector.broadcast %51 : f32 to vector<8x128xf32>
    %56 = arith.addf %54, %55 : vector<8x128xf32>
    %cst_6 = arith.constant 0.000000e+00 : f32
    %57 = vector.broadcast %cst_6 : f32 to vector<8x128xf32>
    %58 = arith.maximumf %56, %57 : vector<8x128xf32>
    %59 = vector.broadcast %52 : f32 to vector<8x128xf32>
    %60 = arith.mulf %59, %58 : vector<8x128xf32>
    %61 = arith.addf %49, %60 : vector<8x128xf32>
    %c5 = arith.constant 5 : index
    %62 = memref.load %arg1[%c5] : memref<49xf32, #tpu.memory_space<smem>>
    %c21 = arith.constant 21 : index
    %63 = memref.load %arg1[%c21] : memref<49xf32, #tpu.memory_space<smem>>
    %c37 = arith.constant 37 : index
    %64 = memref.load %arg1[%c37] : memref<49xf32, #tpu.memory_space<smem>>
    %65 = vector.broadcast %62 : f32 to vector<8x128xf32>
    %66 = arith.mulf %0, %65 : vector<8x128xf32>
    %67 = vector.broadcast %63 : f32 to vector<8x128xf32>
    %68 = arith.addf %66, %67 : vector<8x128xf32>
    %cst_7 = arith.constant 0.000000e+00 : f32
    %69 = vector.broadcast %cst_7 : f32 to vector<8x128xf32>
    %70 = arith.maximumf %68, %69 : vector<8x128xf32>
    %71 = vector.broadcast %64 : f32 to vector<8x128xf32>
    %72 = arith.mulf %71, %70 : vector<8x128xf32>
    %73 = arith.addf %61, %72 : vector<8x128xf32>
    %c6 = arith.constant 6 : index
    %74 = memref.load %arg1[%c6] : memref<49xf32, #tpu.memory_space<smem>>
    %c22 = arith.constant 22 : index
    %75 = memref.load %arg1[%c22] : memref<49xf32, #tpu.memory_space<smem>>
    %c38 = arith.constant 38 : index
    %76 = memref.load %arg1[%c38] : memref<49xf32, #tpu.memory_space<smem>>
    %77 = vector.broadcast %74 : f32 to vector<8x128xf32>
    %78 = arith.mulf %0, %77 : vector<8x128xf32>
    %79 = vector.broadcast %75 : f32 to vector<8x128xf32>
    %80 = arith.addf %78, %79 : vector<8x128xf32>
    %cst_8 = arith.constant 0.000000e+00 : f32
    %81 = vector.broadcast %cst_8 : f32 to vector<8x128xf32>
    %82 = arith.maximumf %80, %81 : vector<8x128xf32>
    %83 = vector.broadcast %76 : f32 to vector<8x128xf32>
    %84 = arith.mulf %83, %82 : vector<8x128xf32>
    %85 = arith.addf %73, %84 : vector<8x128xf32>
    %c7 = arith.constant 7 : index
    %86 = memref.load %arg1[%c7] : memref<49xf32, #tpu.memory_space<smem>>
    %c23 = arith.constant 23 : index
    %87 = memref.load %arg1[%c23] : memref<49xf32, #tpu.memory_space<smem>>
    %c39 = arith.constant 39 : index
    %88 = memref.load %arg1[%c39] : memref<49xf32, #tpu.memory_space<smem>>
    %89 = vector.broadcast %86 : f32 to vector<8x128xf32>
    %90 = arith.mulf %0, %89 : vector<8x128xf32>
    %91 = vector.broadcast %87 : f32 to vector<8x128xf32>
    %92 = arith.addf %90, %91 : vector<8x128xf32>
    %cst_9 = arith.constant 0.000000e+00 : f32
    %93 = vector.broadcast %cst_9 : f32 to vector<8x128xf32>
    %94 = arith.maximumf %92, %93 : vector<8x128xf32>
    %95 = vector.broadcast %88 : f32 to vector<8x128xf32>
    %96 = arith.mulf %95, %94 : vector<8x128xf32>
    %97 = arith.addf %85, %96 : vector<8x128xf32>
    %c8 = arith.constant 8 : index
    %98 = memref.load %arg1[%c8] : memref<49xf32, #tpu.memory_space<smem>>
    %c24 = arith.constant 24 : index
    %99 = memref.load %arg1[%c24] : memref<49xf32, #tpu.memory_space<smem>>
    %c40 = arith.constant 40 : index
    %100 = memref.load %arg1[%c40] : memref<49xf32, #tpu.memory_space<smem>>
    %101 = vector.broadcast %98 : f32 to vector<8x128xf32>
    %102 = arith.mulf %0, %101 : vector<8x128xf32>
    %103 = vector.broadcast %99 : f32 to vector<8x128xf32>
    %104 = arith.addf %102, %103 : vector<8x128xf32>
    %cst_10 = arith.constant 0.000000e+00 : f32
    %105 = vector.broadcast %cst_10 : f32 to vector<8x128xf32>
    %106 = arith.maximumf %104, %105 : vector<8x128xf32>
    %107 = vector.broadcast %100 : f32 to vector<8x128xf32>
    %108 = arith.mulf %107, %106 : vector<8x128xf32>
    %109 = arith.addf %97, %108 : vector<8x128xf32>
    %c9 = arith.constant 9 : index
    %110 = memref.load %arg1[%c9] : memref<49xf32, #tpu.memory_space<smem>>
    %c25 = arith.constant 25 : index
    %111 = memref.load %arg1[%c25] : memref<49xf32, #tpu.memory_space<smem>>
    %c41 = arith.constant 41 : index
    %112 = memref.load %arg1[%c41] : memref<49xf32, #tpu.memory_space<smem>>
    %113 = vector.broadcast %110 : f32 to vector<8x128xf32>
    %114 = arith.mulf %0, %113 : vector<8x128xf32>
    %115 = vector.broadcast %111 : f32 to vector<8x128xf32>
    %116 = arith.addf %114, %115 : vector<8x128xf32>
    %cst_11 = arith.constant 0.000000e+00 : f32
    %117 = vector.broadcast %cst_11 : f32 to vector<8x128xf32>
    %118 = arith.maximumf %116, %117 : vector<8x128xf32>
    %119 = vector.broadcast %112 : f32 to vector<8x128xf32>
    %120 = arith.mulf %119, %118 : vector<8x128xf32>
    %121 = arith.addf %109, %120 : vector<8x128xf32>
    %c10 = arith.constant 10 : index
    %122 = memref.load %arg1[%c10] : memref<49xf32, #tpu.memory_space<smem>>
    %c26 = arith.constant 26 : index
    %123 = memref.load %arg1[%c26] : memref<49xf32, #tpu.memory_space<smem>>
    %c42 = arith.constant 42 : index
    %124 = memref.load %arg1[%c42] : memref<49xf32, #tpu.memory_space<smem>>
    %125 = vector.broadcast %122 : f32 to vector<8x128xf32>
    %126 = arith.mulf %0, %125 : vector<8x128xf32>
    %127 = vector.broadcast %123 : f32 to vector<8x128xf32>
    %128 = arith.addf %126, %127 : vector<8x128xf32>
    %cst_12 = arith.constant 0.000000e+00 : f32
    %129 = vector.broadcast %cst_12 : f32 to vector<8x128xf32>
    %130 = arith.maximumf %128, %129 : vector<8x128xf32>
    %131 = vector.broadcast %124 : f32 to vector<8x128xf32>
    %132 = arith.mulf %131, %130 : vector<8x128xf32>
    %133 = arith.addf %121, %132 : vector<8x128xf32>
    %c11 = arith.constant 11 : index
    %134 = memref.load %arg1[%c11] : memref<49xf32, #tpu.memory_space<smem>>
    %c27 = arith.constant 27 : index
    %135 = memref.load %arg1[%c27] : memref<49xf32, #tpu.memory_space<smem>>
    %c43 = arith.constant 43 : index
    %136 = memref.load %arg1[%c43] : memref<49xf32, #tpu.memory_space<smem>>
    %137 = vector.broadcast %134 : f32 to vector<8x128xf32>
    %138 = arith.mulf %0, %137 : vector<8x128xf32>
    %139 = vector.broadcast %135 : f32 to vector<8x128xf32>
    %140 = arith.addf %138, %139 : vector<8x128xf32>
    %cst_13 = arith.constant 0.000000e+00 : f32
    %141 = vector.broadcast %cst_13 : f32 to vector<8x128xf32>
    %142 = arith.maximumf %140, %141 : vector<8x128xf32>
    %143 = vector.broadcast %136 : f32 to vector<8x128xf32>
    %144 = arith.mulf %143, %142 : vector<8x128xf32>
    %145 = arith.addf %133, %144 : vector<8x128xf32>
    %c12 = arith.constant 12 : index
    %146 = memref.load %arg1[%c12] : memref<49xf32, #tpu.memory_space<smem>>
    %c28 = arith.constant 28 : index
    %147 = memref.load %arg1[%c28] : memref<49xf32, #tpu.memory_space<smem>>
    %c44 = arith.constant 44 : index
    %148 = memref.load %arg1[%c44] : memref<49xf32, #tpu.memory_space<smem>>
    %149 = vector.broadcast %146 : f32 to vector<8x128xf32>
    %150 = arith.mulf %0, %149 : vector<8x128xf32>
    %151 = vector.broadcast %147 : f32 to vector<8x128xf32>
    %152 = arith.addf %150, %151 : vector<8x128xf32>
    %cst_14 = arith.constant 0.000000e+00 : f32
    %153 = vector.broadcast %cst_14 : f32 to vector<8x128xf32>
    %154 = arith.maximumf %152, %153 : vector<8x128xf32>
    %155 = vector.broadcast %148 : f32 to vector<8x128xf32>
    %156 = arith.mulf %155, %154 : vector<8x128xf32>
    %157 = arith.addf %145, %156 : vector<8x128xf32>
    %c13 = arith.constant 13 : index
    %158 = memref.load %arg1[%c13] : memref<49xf32, #tpu.memory_space<smem>>
    %c29 = arith.constant 29 : index
    %159 = memref.load %arg1[%c29] : memref<49xf32, #tpu.memory_space<smem>>
    %c45 = arith.constant 45 : index
    %160 = memref.load %arg1[%c45] : memref<49xf32, #tpu.memory_space<smem>>
    %161 = vector.broadcast %158 : f32 to vector<8x128xf32>
    %162 = arith.mulf %0, %161 : vector<8x128xf32>
    %163 = vector.broadcast %159 : f32 to vector<8x128xf32>
    %164 = arith.addf %162, %163 : vector<8x128xf32>
    %cst_15 = arith.constant 0.000000e+00 : f32
    %165 = vector.broadcast %cst_15 : f32 to vector<8x128xf32>
    %166 = arith.maximumf %164, %165 : vector<8x128xf32>
    %167 = vector.broadcast %160 : f32 to vector<8x128xf32>
    %168 = arith.mulf %167, %166 : vector<8x128xf32>
    %169 = arith.addf %157, %168 : vector<8x128xf32>
    %c14 = arith.constant 14 : index
    %170 = memref.load %arg1[%c14] : memref<49xf32, #tpu.memory_space<smem>>
    %c30 = arith.constant 30 : index
    %171 = memref.load %arg1[%c30] : memref<49xf32, #tpu.memory_space<smem>>
    %c46 = arith.constant 46 : index
    %172 = memref.load %arg1[%c46] : memref<49xf32, #tpu.memory_space<smem>>
    %173 = vector.broadcast %170 : f32 to vector<8x128xf32>
    %174 = arith.mulf %0, %173 : vector<8x128xf32>
    %175 = vector.broadcast %171 : f32 to vector<8x128xf32>
    %176 = arith.addf %174, %175 : vector<8x128xf32>
    %cst_16 = arith.constant 0.000000e+00 : f32
    %177 = vector.broadcast %cst_16 : f32 to vector<8x128xf32>
    %178 = arith.maximumf %176, %177 : vector<8x128xf32>
    %179 = vector.broadcast %172 : f32 to vector<8x128xf32>
    %180 = arith.mulf %179, %178 : vector<8x128xf32>
    %181 = arith.addf %169, %180 : vector<8x128xf32>
    %c15 = arith.constant 15 : index
    %182 = memref.load %arg1[%c15] : memref<49xf32, #tpu.memory_space<smem>>
    %c31 = arith.constant 31 : index
    %183 = memref.load %arg1[%c31] : memref<49xf32, #tpu.memory_space<smem>>
    %c47 = arith.constant 47 : index
    %184 = memref.load %arg1[%c47] : memref<49xf32, #tpu.memory_space<smem>>
    %185 = vector.broadcast %182 : f32 to vector<8x128xf32>
    %186 = arith.mulf %0, %185 : vector<8x128xf32>
    %187 = vector.broadcast %183 : f32 to vector<8x128xf32>
    %188 = arith.addf %186, %187 : vector<8x128xf32>
    %cst_17 = arith.constant 0.000000e+00 : f32
    %189 = vector.broadcast %cst_17 : f32 to vector<8x128xf32>
    %190 = arith.maximumf %188, %189 : vector<8x128xf32>
    %191 = vector.broadcast %184 : f32 to vector<8x128xf32>
    %192 = arith.mulf %191, %190 : vector<8x128xf32>
    %193 = arith.addf %181, %192 : vector<8x128xf32>
    %c48 = arith.constant 48 : index
    %194 = memref.load %arg1[%c48] : memref<49xf32, #tpu.memory_space<smem>>
    %195 = vector.broadcast %194 : f32 to vector<8x128xf32>
    %196 = arith.addf %193, %195 : vector<8x128xf32>
    %c0_18 = arith.constant 0 : index
    %c0_19 = arith.constant 0 : index
    %197 = vector.load %arg3[%c0_18, %c0_19] : memref<8x128xf32, #tpu.memory_space<vmem>>, vector<8x128xf32>
    tpu.vector_store %arg3[%c0_18, %c0_19], %196 {strides = array<i32>} : memref<8x128xf32, #tpu.memory_space<vmem>>, vector<8x128xf32>,
    return
  }
  func.func @transform_0(%arg0: i32) -> i32 {
    %c0_i32 = arith.constant 0 : i32
    %c0_i32_0 = arith.constant 0 : i32
    return %c0_i32 : i32
  }
  func.func @transform_1(%arg0: i32) -> (i32, i32) {
    %c0_i32 = arith.constant 0 : i32
    %c0_i32_0 = arith.constant 0 : i32
    return %arg0, %c0_i32 : i32, i32
  }
  func.func @transform_2(%arg0: i32) -> (i32, i32) {
    %c0_i32 = arith.constant 0 : i32
    %c0_i32_0 = arith.constant 0 : i32
    return %arg0, %c0_i32 : i32, i32
  }
}

</mosaic_0001>

<bundles_post_ra>
// kernel: tpu_custom_call.1
= control target key start
LH: loop header
LB: loop body
LE: loop exit
PB: predicated region body
PF: predicated region fallthrough
CT: control target
= control target key end

     0   :  { %7 = vsyncpa [#allocation5], 0  ;;  %s541_s0 = inlined_call_operand.hbm [shape: f32[49], index: 0, kind: input, shape index: {}]   ;;  %s542_s1 = inlined_call_operand.hbm [shape: f32[8,128], index: 1, kind: input, shape index: {}]   ;;  %s543_s2 = inlined_call_operand.hbm [shape: f32[8,128], index: 2, kind: output, shape index: {}]  }
   0x1   :  { %8 = vsyncpa [#allocation3], 0 }
   0x2   :  { %9 = vsyncpa [#allocation4], 0  ;;  %s283_s11 = scalar_lea.hbm %s541_s0, 16 }
   0x3   :  { %p284_p0 = scmp.ne.s32.totalorder %s541_s0, %s283_s11  ;;  %p287_p1 = scmp.lt.u32.totalorder %s283_s11, %s541_s0 }
   0x5   :  { %p289_p2 = pnand %p287_p1, %p284_p0 }
   0x7   :  { %292 = shalt.err (!%p289_p2)
}
   0x8   :  { %s343_s16 = smov [#allocation2]   ;;  %s344_s19 = smov [#allocation6]  }
   0x9   :  { %17 = dma.hbm_to_smem %s541_s0, 16, %s343_s16, [#allocation5]  }
   0xa   :  { %s24_s20 = sshll.u32 %s344_s19, 4  ;;  %s293_s23 = scalar_lea.hbm %s542_s1, 128  ;;  %s25_s20 = int_to_ptr.vmem [resolvable:$true] %s24_s20 }
   0xb   :  { %p294_p3 = scmp.ne.s32.totalorder %s542_s1, %s293_s23  ;;  %p297_p4 = scmp.lt.u32.totalorder %s293_s23, %s542_s1 }
   0xd   :  { %p299_p5 = pnand %p297_p4, %p294_p3 }
   0xf   :  { %302 = shalt.err (!%p299_p5)
}
  0x10   :  { %s303_s28 = scalar_lea.vmem %s25_s20, 128  ;;  %p308_p7 = scmp.lt.s32.totalorder %s25_s20, %s25_s20 }
  0x11   :  { %p304_p6 = scmp.ne.s32.totalorder %s25_s20, %s303_s28  ;;  %p309_p8 = scmp.lt.s32.totalorder %s303_s28, %s303_s28 }
  0x13   :  { %p310_p9 = por %p309_p8, %p308_p7 }
  0x15   :  { %p311_p10 = pnand %p310_p9, %p304_p6 }
  0x17   :  { %314 = shalt.err (!%p311_p10)
}
  0x18   :  { %27 = dma.hbm_to_vmem [thread:$0]  %s542_s1, 128, %s25_s20, [#allocation3]  }
  0x19   :  { %337 = dma.done.wait [#allocation5], 16  }
  0x1a   :  { %338 = vsyncadd [#allocation5], 4294967280 }
  0x1b   :  { %339 = dma.done.wait [#allocation3], 128  }
  0x1c   :  { %340 = vsyncadd [#allocation3], 4294967168 }
  0x1d   :  { %34 = sfence }
  0x1e   :  { %s36_s30 = sld [smem:[#allocation2]]  ;;  %s234_s5 = sld [smem:[#allocation2 + $0x1]]  ;;  %v391_v0 = vld [vmem:[#allocation6] sm:$0xff] }
  0x1f   :  { %s232_s3 = sld [smem:[#allocation2 + $0x10]]  ;;  %s235_s6 = sld [smem:[#allocation2 + $0x11]] }
  0x20   :  { %s385_s4 = sld [smem:[#allocation2 + $0x20]]  ;;  %s387_s7 = sld [smem:[#allocation2 + $0x21]] }
  0x21   :  { %s237_s8 = sld [smem:[#allocation2 + $0x2]]  ;;  %s240_s1 = sld [smem:[#allocation2 + $0x3]] }
  0x22   :  { %s389_s9 = sld [smem:[#allocation2 + $0x12]]  ;;  %s395_s11 = sld [smem:[#allocation2 + $0x13]] }
  0x23   :  { %s393_s10 = sld [smem:[#allocation2 + $0x22]]  ;;  %s397_s12 = sld [smem:[#allocation2 + $0x23]] }
  0x24   :  { %v39_v1 = vstv %s36_s30  ;;  %s399_s13 = sld [smem:[#allocation2 + $0x4]]  ;;  %v50_v4 = vstv %s234_s5  ;;  %s406_s16 = sld [smem:[#allocation2 + $0x5]] }
  0x25   :  { %v41_v2 = vstv %s232_s3  ;;  %s401_s14 = sld [smem:[#allocation2 + $0x14]]  ;;  %v40_v3 = vmul.f32 %v39_v1, %v391_v0  ;;  %v51_v5 = vmul.f32 %v50_v4, %v391_v0  ;;  %v52_v6 = vstv %s235_s6  ;;  %s409_s17 = sld [smem:[#allocation2 + $0x15]] }
  0x26   :  { %s404_s15 = sld [smem:[#allocation2 + $0x24]]  ;;  %v44_v8 = vstv %s385_s4  ;;  %s413_s18 = sld [smem:[#allocation2 + $0x6]]  ;;  %v55_v12 = vstv %s387_s7 }
  0x27   :  { %v42_v7 = vadd.f32 %v41_v2, %v40_v3  ;;  %v61_v9 = vstv %s237_s8  ;;  %s415_s19 = sld [smem:[#allocation2 + $0x16]]  ;;  %v53_v11 = vadd.f32 %v52_v6, %v51_v5  ;;  %v72_v14 = vstv %s240_s1  ;;  %s419_s20 = sld [smem:[#allocation2 + $0x25]] }
  0x28   :  { %v63_v10 = vstv %s389_s9  ;;  %v62_v13 = vmul.f32 %v61_v9, %v391_v0  ;;  %s421_s21 = sld [smem:[#allocation2 + $0x7]]  ;;  %v73_v17 = vmul.f32 %v72_v14, %v391_v0  ;;  %v74_v18 = vstv %s395_s11  ;;  %s426_s22 = sld [smem:[#allocation2 + $0x26]] }
  0x29   :  { %v43_v15 = vmax.f32 %v42_v7, 0.0  ;;  %v66_v16 = vstv %s393_s10  ;;  %s428_s23 = sld [smem:[#allocation2 + $0x17]]  ;;  %v54_v19 = vmax.f32 %v53_v11, 0.0  ;;  %s432_s24 = sld [smem:[#allocation2 + $0x8]]  ;;  %v77_v25 = vstv %s397_s12 }
  0x2a   :  { %v64_v20 = vadd.f32 %v63_v10, %v62_v13  ;;  %v83_v21 = vstv %s399_s13  ;;  %s434_s25 = sld [smem:[#allocation2 + $0x18]]  ;;  %v75_v24 = vadd.f32 %v74_v18, %v73_v17  ;;  %s438_s26 = sld [smem:[#allocation2 + $0x27]]  ;;  %v94_v29 = vstv %s406_s16 }
  0x2b   :  { %v85_v22 = vstv %s401_s14  ;;  %v45_v23 = vmul.f32 %v44_v8, %v43_v15  ;;  %v84_v26 = vmul.f32 %v83_v21, %v391_v0  ;;  %v56_v27 = vmul.f32 %v55_v12, %v54_v19  ;;  %s442_s27 = sld [smem:[#allocation2 + $0x9]]  ;;  %s448_s0 = sld [smem:[#allocation2 + $0x28]] }
  0x2c   :  { %v65_v28 = vmax.f32 %v64_v20, 0.0  ;;  %v96_v30 = vstv %s409_s17  ;;  %s444_s28 = sld [smem:[#allocation2 + $0x19]]  ;;  %v76_v31 = vmax.f32 %v75_v24, 0.0  ;;  %v88_v33 = vstv %s404_s15  ;;  %s452_s29 = sld [smem:[#allocation2 + $0xa]] }
  0x2d   :  { %v86_v32 = vadd.f32 %v85_v22, %v84_v26  ;;  %v95_v34 = vmul.f32 %v94_v29, %v391_v0  ;;  %v57_v35 = vadd.f32 %v56_v27, %v45_v23  ;;  %v105_v37 = vstv %s413_s18  ;;  %s454_s30 = sld [smem:[#allocation2 + $0x1a]]  ;;  %s457_s3 = sld [smem:[#allocation2 + $0x29]] }
  0x2e   :  { %v67_v36 = vmul.f32 %v66_v16, %v65_v28  ;;  %v107_v38 = vstv %s415_s19  ;;  %v78_v39 = vmul.f32 %v77_v25, %v76_v31  ;;  %v106_v42 = vmul.f32 %v105_v37, %v391_v0  ;;  %s462_s4 = sld [smem:[#allocation2 + $0xb]]  ;;  %s467_s6 = sld [smem:[#allocation2 + $0x2a]] }
  0x2f   :  { %v87_v40 = vmax.f32 %v86_v32, 0.0  ;;  %v97_v41 = vadd.f32 %v96_v30, %v95_v34  ;;  %v99_v44 = vstv %s419_s20  ;;  %v116_v45 = vstv %s421_s21  ;;  %s464_s5 = sld [smem:[#allocation2 + $0x1b]]  ;;  %s472_s7 = sld [smem:[#allocation2 + $0xc]] }
  0x30   :  { %v68_v43 = vadd.f32 %v67_v36, %v57_v35  ;;  %v118_v46 = vstv %s428_s23  ;;  %v108_v49 = vadd.f32 %v107_v38, %v106_v42  ;;  %v117_v50 = vmul.f32 %v116_v45, %v391_v0  ;;  %s474_s8 = sld [smem:[#allocation2 + $0x1c]]  ;;  %s477_s9 = sld [smem:[#allocation2 + $0x2b]] }
  0x31   :  { %v89_v47 = vmul.f32 %v88_v33, %v87_v40  ;;  %v98_v48 = vmax.f32 %v97_v41, 0.0  ;;  %v110_v52 = vstv %s426_s22  ;;  %v127_v53 = vstv %s432_s24  ;;  %s482_s10 = sld [smem:[#allocation2 + $0xd]]  ;;  %s487_s11 = sld [smem:[#allocation2 + $0x2c]] }
  0x32   :  { %v79_v51 = vadd.f32 %v78_v39, %v68_v43  ;;  %v129_v54 = vstv %s434_s25  ;;  %v109_v56 = vmax.f32 %v108_v49, 0.0  ;;  %v119_v57 = vadd.f32 %v118_v46, %v117_v50  ;;  %s484_s1 = sld [smem:[#allocation2 + $0x1d]]  ;;  %s492_s12 = sld [smem:[#allocation2 + $0xe]] }
  0x33   :  { %v100_v55 = vmul.f32 %v99_v44, %v98_v48  ;;  %v128_v58 = vmul.f32 %v127_v53, %v391_v0  ;;  %v121_v60 = vstv %s438_s26  ;;  %v138_v61 = vstv %s442_s27  ;;  %s494_s13 = sld [smem:[#allocation2 + $0x1e]]  ;;  %s497_s14 = sld [smem:[#allocation2 + $0x2d]] }
  0x34   :  { %v90_v59 = vadd.f32 %v89_v47, %v79_v51  ;;  %v140_v62 = vstv %s444_s28  ;;  %v111_v63 = vmul.f32 %v110_v52, %v109_v56  ;;  %v120_v1 = vmax.f32 %v119_v57, 0.0  ;;  %s502_s15 = sld [smem:[#allocation2 + $0xf]]  ;;  %s510_s17 = sld [smem:[#allocation2 + $0x2e]] }
  0x35   :  { %v130_v2 = vadd.f32 %v129_v54, %v128_v58  ;;  %v139_v3 = vmul.f32 %v138_v61, %v391_v0  ;;  %v132_v5 = vstv %s448_s0  ;;  %v149_v6 = vstv %s452_s29  ;;  %s504_s16 = sld [smem:[#allocation2 + $0x1f]]  ;;  %s279_s19 = sld [smem:[#allocation2 + $0x30]] }
  0x36   :  { %v101_v4 = vadd.f32 %v100_v55, %v90_v59  ;;  %v151_v7 = vstv %s454_s30  ;;  %v122_v8 = vmul.f32 %v121_v60, %v120_v1  ;;  %v150_v11 = vmul.f32 %v149_v6, %v391_v0  ;;  %s516_s18 = sld [smem:[#allocation2 + $0x2f]]  ;;  %s345_s20 = smov [#allocation7]  }
  0x37   :  { %v131_v9 = vmax.f32 %v130_v2, 0.0  ;;  %v141_v10 = vadd.f32 %v140_v62, %v139_v3  ;;  %v143_v13 = vstv %s457_s3  ;;  %v160_v14 = vstv %s462_s4  ;;  %s222_s21 = sshll.u32 %s345_s20, 4  ;;  %s223_s21 = int_to_ptr.vmem [resolvable:$true] %s222_s21 }
  0x38   :  { %v112_v12 = vadd.f32 %v111_v63, %v101_v4  ;;  %v162_v15 = vstv %s464_s5  ;;  %v152_v18 = vadd.f32 %v151_v7, %v150_v11  ;;  %v161_v19 = vmul.f32 %v160_v14, %v391_v0  ;;  %s315_s22 = scalar_lea.vmem %s223_s21, 128  ;;  %p320_p12 = scmp.lt.s32.totalorder %s223_s21, %s223_s21 }
  0x39   :  { %v133_v16 = vmul.f32 %v132_v5, %v131_v9  ;;  %v142_v17 = vmax.f32 %v141_v10, 0.0  ;;  %v154_v21 = vstv %s467_s6  ;;  %v171_v22 = vstv %s472_s7  ;;  %p316_p11 = scmp.ne.s32.totalorder %s223_s21, %s315_s22  ;;  %p321_p13 = scmp.lt.s32.totalorder %s315_s22, %s315_s22 }
  0x3a   :  { %v123_v20 = vadd.f32 %v122_v8, %v112_v12  ;;  %v173_v23 = vstv %s474_s8  ;;  %v153_v25 = vmax.f32 %v152_v18, 0.0  ;;  %v163_v26 = vadd.f32 %v162_v15, %v161_v19 }
  0x3b   :  { %v144_v24 = vmul.f32 %v143_v13, %v142_v17  ;;  %v172_v27 = vmul.f32 %v171_v22, %v391_v0  ;;  %v165_v29 = vstv %s477_s9  ;;  %v182_v30 = vstv %s482_s10  ;;  %p322_p0 = por %p321_p13, %p320_p12 }
  0x3c   :  { %v134_v28 = vadd.f32 %v133_v16, %v123_v20  ;;  %v184_v31 = vstv %s484_s1  ;;  %v155_v32 = vmul.f32 %v154_v21, %v153_v25  ;;  %v164_v33 = vmax.f32 %v163_v26, 0.0 }
  0x3d   :  { %v174_v34 = vadd.f32 %v173_v23, %v172_v27  ;;  %v183_v35 = vmul.f32 %v182_v30, %v391_v0  ;;  %v176_v37 = vstv %s487_s11  ;;  %v193_v38 = vstv %s492_s12  ;;  %p323_p1 = pnand %p322_p0, %p316_p11 }
  0x3e   :  { %v145_v36 = vadd.f32 %v144_v24, %v134_v28  ;;  %v195_v39 = vstv %s494_s13  ;;  %v166_v40 = vmul.f32 %v165_v29, %v164_v33  ;;  %v194_v43 = vmul.f32 %v193_v38, %v391_v0 }
  0x3f   :  { %v175_v41 = vmax.f32 %v174_v34, 0.0  ;;  %v185_v42 = vadd.f32 %v184_v31, %v183_v35  ;;  %v187_v45 = vstv %s497_s14  ;;  %v204_v46 = vstv %s502_s15 }
  0x40   :  { %v156_v44 = vadd.f32 %v155_v32, %v145_v36  ;;  %v206_v47 = vstv %s504_s16  ;;  %v196_v50 = vadd.f32 %v195_v39, %v194_v43  ;;  %v205_v51 = vmul.f32 %v204_v46, %v391_v0 }
  0x41   :  { %v177_v48 = vmul.f32 %v176_v37, %v175_v41  ;;  %v186_v49 = vmax.f32 %v185_v42, 0.0  ;;  %v198_v53 = vstv %s510_s17  ;;  %v209_v58 = vstv %s516_s18 }
  0x42   :  { %v167_v52 = vadd.f32 %v166_v40, %v156_v44  ;;  %v197_v55 = vmax.f32 %v196_v50, 0.0  ;;  %v207_v56 = vadd.f32 %v206_v47, %v205_v51  ;;  %v213_v1 = vstv %s279_s19 }
  0x43   :  { %v188_v54 = vmul.f32 %v187_v45, %v186_v49 }
  0x44   :  { %v178_v57 = vadd.f32 %v177_v48, %v167_v52  ;;  %v199_v59 = vmul.f32 %v198_v53, %v197_v55  ;;  %v208_v60 = vmax.f32 %v207_v56, 0.0 }
  0x46   :  { %v189_v61 = vadd.f32 %v188_v54, %v178_v57  ;;  %v210_v62 = vmul.f32 %v209_v58, %v208_v60 }
  0x48   :  { %v200_v63 = vadd.f32 %v199_v59, %v189_v61 }
  0x4a   :  { %v211_v2 = vadd.f32 %v210_v62, %v200_v63 }
  0x4c   :  { %v214_v3 = vadd.f32 %v213_v1, %v211_v2 }
  0x4e   :  { %215 = vst [vmem:[#allocation7] sm:$0xff] %v214_v3 }
  0x4f   :  { %326 = shalt.err (!%p323_p1)
}
  0x50   :  { %s327_s25 = scalar_lea.hbm %s543_s2, 128 }
  0x51   :  { %p328_p2 = scmp.ne.s32.totalorder %s543_s2, %s327_s25  ;;  %p331_p3 = scmp.lt.u32.totalorder %s327_s25, %s543_s2 }
  0x53   :  { %p333_p4 = pnand %p331_p3, %p328_p2 }
  0x55   :  { %336 = shalt.err (!%p333_p4)
}
  0x56   :  { %225 = dma.vmem_to_hbm [thread:$0]  %s223_s21, 128, %s543_s2, [#allocation4]  }
  0x57   :  { %341 = dma.done.wait [#allocation4], 128  }
  0x58   :  { %342 = vsyncadd [#allocation4], 4294967168 }
  0x59   :  { %229 = vsyncpa [#allocation3], 1 }
  0x5a   :  { %230 = vsyncpa [#allocation4], 1 }
  0x5b   :  { %231 = vsyncpa [#allocation5], 1 }

</bundles_post_ra>
